<compile_context>
chip_gen: v7x
topology: tpu7x:2x2x1
jax: 0.10.0
libtpu: 0.0.40
codegen_flags: <defaults>
</compile_context>

<pallas_src>
import jax
import jax.numpy as jnp
from jax.experimental import pallas as pl
from jax.experimental.pallas import tpu as pltpu

ALPHA = 0.2
SCALE = 1.531320475574866
_C1S = (1.0 + ALPHA) / 2.0 * SCALE   # scale folded in
_C2S = (1.0 - ALPHA) / 2.0 * SCALE

_MIB = 1024 * 1024
_MIN_TILE_BYTES = 1 * _MIB            # tiles below ~1 MiB fall off the roofline plateau
_SINGLE_BLOCK_MAX_BYTES = 512 * 1024  # tiny slabs: one full-array block is enough
_SMALL_FALLBACK_ELEMS = 1024          # below this a kernel launch isn't worth it
_QUANT_1D = 4096                      # 1-D block granularity (32*128, covers all dtypes)


def _round_up(x, m):
    return -(-x // m) * m


def _sublane(itemsize):
    # Native packed sublane count (f32: 8, bf16/f16: 16). Float inputs assumed.
    return {4: 8, 2: 16}.get(itemsize, 8)


def _formula_f32(xf):
    # x * (C1S + C2S * tanh(x/2)); tanh goes to the EUP (free slot vs VPU).
    return xf * (jnp.float32(_C1S) + jnp.float32(_C2S) * jnp.tanh(jnp.float32(0.5) * xf))


def _scaled_smooth_leaky_relu_kernel(x_ref, o_ref):
    # Compute in f32; the kernel is HBM-bound so the upcast is free filler.
    xf = x_ref[...].astype(jnp.float32)
    o_ref[...] = _formula_f32(xf).astype(o_ref.dtype)


def _vmem_capacity_bytes(default=64 * _MIB):
    # Trace-time hardware query; fall back to the v7x (smallest) value.
    try:
        return int(getattr(pltpu.get_tpu_info(), "vmem_capacity_bytes", default))
    except Exception:
        return default


def scaled_smooth_leaky_relu(x, *, target_tile_bytes=None):
    orig_shape, dtype = x.shape, x.dtype
    n = x.size
    if n == 0:
        return x
    if n < _SMALL_FALLBACK_ELEMS:
        # Too small for a kernel launch to be worthwhile.
        return _formula_f32(x.astype(jnp.float32)).astype(dtype)

    itemsize = jnp.dtype(dtype).itemsize
    slab_bytes = n * itemsize

    vmem_cap = _vmem_capacity_bytes()
    if target_tile_bytes is None:
        # 4 MiB tiles sit on the HBM-roofline plateau everywhere; v5e/v6e
        # (128 MiB VMEM) can afford 8 MiB, v7x (64 MiB VMEM) should not go higher.
        target_tile_bytes = 8 * _MIB if vmem_cap >= 96 * _MIB else 4 * _MIB

    # Grid-step count: >=4-8 steps for medium/large slabs (so in-DMA, compute and
    # out-DMA of adjacent steps overlap), rounded up to an even count so v7x's two
    # TensorCores get balanced work, while keeping tiles >= ~1 MiB.
    if slab_bytes <= _SINGLE_BLOCK_MAX_BYTES:
        steps = 1
    else:
        steps = max(pl.cdiv(slab_bytes, target_tile_bytes),
                    min(8, slab_bytes // _MIN_TILE_BYTES),
                    2)
        steps = _round_up(steps, 2)

    x_flat = x.reshape(-1)

    # Widest lane count (multiple of 128) dividing n -> zero-copy reshape to a
    # lane-dense 2-D slab (wide unmasked vector stores). If n is NOT a multiple
    # of 128, run the kernel 1-D over the flat array and let Pallas mask the
    # ragged last block — no pad / concatenate passes over HBM.
    cols = 0
    for c in (4096, 2048, 1024, 512, 256, 128):
        if n % c == 0:
            cols = c
            break

    if cols:
        rows = n // cols
        arr = x_flat.reshape(rows, cols)
        if steps == 1:
            block_rows = rows                       # full-array block: always legal
        else:
            sub = _sublane(itemsize)
            block_rows = min(rows, max(sub, _round_up(pl.cdiv(rows, steps), sub)))
        grid = pl.cdiv(rows, block_rows)
        block_shape = (block_rows, cols)
        index_map = lambda i: (i, 0)
        out_struct = jax.ShapeDtypeStruct((rows, cols), dtype)
        tile_elems = block_rows * cols
    else:
        arr = x_flat
        if steps == 1:
            block_elems = n                         # full-array block: always legal
        else:
            block_elems = min(n, _round_up(pl.cdiv(n, steps), _QUANT_1D))
        grid = pl.cdiv(n, block_elems)
        block_shape = (block_elems,)
        index_map = lambda i: (i,)
        out_struct = jax.ShapeDtypeStruct((n,), dtype)
        tile_elems = block_elems

    tile_bytes = tile_elems * itemsize
    # In+out double-buffered (4 buffers) plus Mosaic internal scratch must fit;
    # never request more than half of physical VMEM (v7x has only 64 MiB per TC).
    vmem_limit = int(min(vmem_cap // 2, max(32 * _MIB, 8 * tile_bytes)))

    out = pl.pallas_call(
        _scaled_smooth_leaky_relu_kernel,
        out_shape=out_struct,
        grid_spec=pltpu.PrefetchScalarGridSpec(
            num_scalar_prefetch=0,
            grid=(grid,),
            in_specs=[pl.BlockSpec(block_shape, index_map)],
            out_specs=pl.BlockSpec(block_shape, index_map),
        ),
        compiler_params=pltpu.CompilerParams(
            dimension_semantics=("parallel",),
            vmem_limit_bytes=vmem_limit,
        ),
        cost_estimate=pl.CostEstimate(
            flops=4 * n,
            transcendentals=n,
            bytes_accessed=2 * n * itemsize,
        ),
    )(arr)

    return out.reshape(orig_shape)


def _reference(x):
    xf = x.astype(jnp.float32)
    x1 = (1.0 + ALPHA) / 2.0 * xf
    x2 = (1.0 - ALPHA) / 2.0 * xf * (2.0 * jax.nn.sigmoid(xf) - 1.0)
    return ((x1 + x2) * SCALE).astype(x.dtype)


if __name__ == "__main__":
    key = jax.random.PRNGKey(0)
    # Shape consistent with an Equiformer activation input (elementwise op).
    x = jax.random.normal(key, (2, 4, 16, 16), dtype=jnp.float32)
    out = jax.block_until_ready(scaled_smooth_leaky_relu(x))
    ref = _reference(x)
    assert out.shape == x.shape and out.dtype == x.dtype
    assert float(jnp.max(jnp.abs(out - ref))) < 5e-5, "mismatch vs reference"

    # Ragged element count (not a multiple of 128): masked 1-D path, no concat.
    x2 = jax.random.normal(jax.random.PRNGKey(1), (560, 257), dtype=jnp.float32)
    out2 = jax.block_until_ready(scaled_smooth_leaky_relu(x2))
    assert out2.shape == x2.shape and out2.dtype == x2.dtype
    assert float(jnp.max(jnp.abs(out2 - _reference(x2)))) < 5e-5, "ragged mismatch"

    # Lane-aligned multi-step slab: exercises the pipelined 2-D multi-block path.
    x3 = jax.random.normal(jax.random.PRNGKey(2), (256, 4096), dtype=jnp.float32)
    out3 = jax.block_until_ready(scaled_smooth_leaky_relu(x3))
    assert float(jnp.max(jnp.abs(out3 - _reference(x3)))) < 5e-5, "multi-step mismatch"

    # Tiny array: pure-jnp fallback path.
    x4 = jax.random.normal(jax.random.PRNGKey(3), (3, 7, 11), dtype=jnp.float32)
    out4 = jax.block_until_ready(scaled_smooth_leaky_relu(x4))
    assert float(jnp.max(jnp.abs(out4 - _reference(x4)))) < 5e-5, "tiny mismatch"

    print("KERNEL_OK")
</pallas_src>

<mosaic_0001>
module attributes {stable_mosaic.version = 11 : i64} {
  func.func @_scaled_smooth_leaky_relu_kernel(%arg0: i32, %arg1: memref<1x2048xf32, #tpu.memory_space<vmem>>, %arg2: memref<1x2048xf32, #tpu.memory_space<vmem>>) attributes {dimension_semantics = [#tpu.dimension_semantics<parallel>], iteration_bounds = array<i64: 1>, scalar_prefetch = 0 : i64, scratch_operands = 0 : i64, tpu.core_type = #tpu.core_type<tc>, window_params = [{transform_indices = @transform_0, window_bounds = array<i64: 1, 2048>}, {transform_indices = @transform_1, window_bounds = array<i64: 1, 2048>}]} {
    %c0 = arith.constant 0 : index
    %c0_0 = arith.constant 0 : index
    %0 = vector.load %arg1[%c0, %c0_0] : memref<1x2048xf32, #tpu.memory_space<vmem>>, vector<1x2048xf32>
    %cst = arith.constant 5.000000e-01 : f32
    %1 = vector.broadcast %cst : f32 to vector<1x2048xf32>
    %2 = arith.mulf %1, %0 : vector<1x2048xf32>
    %3 = math.tanh %2 : vector<1x2048xf32>
    %cst_1 = arith.constant 0.612528205 : f32
    %4 = vector.broadcast %cst_1 : f32 to vector<1x2048xf32>
    %5 = arith.mulf %4, %3 : vector<1x2048xf32>
    %cst_2 = arith.constant 0.918792307 : f32
    %6 = vector.broadcast %cst_2 : f32 to vector<1x2048xf32>
    %7 = arith.addf %6, %5 : vector<1x2048xf32>
    %8 = arith.mulf %0, %7 : vector<1x2048xf32>
    %c0_3 = arith.constant 0 : index
    %c0_4 = arith.constant 0 : index
    %9 = vector.load %arg2[%c0_3, %c0_4] : memref<1x2048xf32, #tpu.memory_space<vmem>>, vector<1x2048xf32>
    tpu.vector_store %arg2[%c0_3, %c0_4], %8 {strides = array<i32>} : memref<1x2048xf32, #tpu.memory_space<vmem>>, vector<1x2048xf32>,
    return
  }
  func.func @transform_0(%arg0: i32) -> (i32, i32) {
    %c0_i32 = arith.constant 0 : i32
    %c0_i32_0 = arith.constant 0 : i32
    return %arg0, %c0_i32 : i32, i32
  }
  func.func @transform_1(%arg0: i32) -> (i32, i32) {
    %c0_i32 = arith.constant 0 : i32
    %c0_i32_0 = arith.constant 0 : i32
    return %arg0, %c0_i32 : i32, i32
  }
}

</mosaic_0001>

<bundles_post_ra>
// kernel: tpu_custom_call.1
= control target key start
LH: loop header
LB: loop body
LE: loop exit
PB: predicated region body
PF: predicated region fallthrough
CT: control target
= control target key end

     0   :  { %6 = vsyncpa [#allocation3], 0  ;;  %s140_s0 = inlined_call_operand.hbm [shape: f32[1,2048], index: 0, kind: input, shape index: {}]   ;;  %s141_s1 = inlined_call_operand.hbm [shape: f32[1,2048], index: 1, kind: output, shape index: {}]  }
   0x1   :  { %7 = vsyncpa [#allocation4], 0  ;;  %s104_s6 = smov [#allocation2]   ;;  %s56_s10 = scalar_lea.hbm %s140_s0, 256 }
   0x2   :  { %s14_s7 = sshll.u32 %s104_s6, 4  ;;  %p57_p0 = scmp.ne.s32.totalorder %s140_s0, %s56_s10  ;;  %s15_s7 = int_to_ptr.vmem [resolvable:$true] %s14_s7 }
   0x3   :  { %p60_p1 = scmp.lt.u32.totalorder %s56_s10, %s140_s0 }
   0x5   :  { %p62_p2 = pnand %p60_p1, %p57_p0 }
   0x7   :  { %65 = shalt.err (!%p62_p2)
}
   0x8   :  { %s66_s15 = scalar_lea.vmem %s15_s7, 256  ;;  %p71_p4 = scmp.lt.s32.totalorder %s15_s7, %s15_s7 }
   0x9   :  { %p67_p3 = scmp.ne.s32.totalorder %s15_s7, %s66_s15  ;;  %p72_p5 = scmp.lt.s32.totalorder %s66_s15, %s66_s15 }
   0xb   :  { %p73_p6 = por %p72_p5, %p71_p4 }
   0xd   :  { %p74_p7 = pnand %p73_p6, %p67_p3 }
   0xf   :  { %77 = shalt.err (!%p74_p7)
}
  0x10   :  { %17 = dma.hbm_to_vmem [thread:$0]  %s140_s0, 256, %s15_s7, [#allocation3]  }
  0x11   :  { %100 = dma.done.wait [#allocation3], 256  }
  0x12   :  { %101 = vsyncadd [#allocation3], 4294967040  ;;  %v21_v0 = vld [vmem:[#allocation2] sm:$0xff]  ;;  %v22_v1 = vld [vmem:[#allocation2 + $0x8] sm:$0xff]  ;;  %s105_s18 = smov [#allocation5]  }
  0x13   :  { %v23_v2 = vmul.f32 0.5, %v21_v0  ;;  %v24_v3 = vmul.f32 0.5, %v22_v1  ;;  %s41_s19 = sshll.u32 %s105_s18, 4  ;;  %s42_s19 = int_to_ptr.vmem [resolvable:$true] %s41_s19 }
  0x14   :  { %s78_s0 = scalar_lea.vmem %s42_s19, 256  ;;  %p83_p9 = scmp.lt.s32.totalorder %s42_s19, %s42_s19 }
  0x15   :  { %52 = vtanh.f32 %v23_v2  ;;  %p79_p8 = scmp.ne.s32.totalorder %s42_s19, %s78_s0  ;;  %p84_p10 = scmp.lt.s32.totalorder %s78_s0, %s78_s0 }
  0x16   :  { %54 = vtanh.f32 %v24_v3 }
  0x17   :  { %p85_p11 = por %p84_p10, %p83_p9 }
  0x19   :  { %p86_p12 = pnand %p85_p11, %p79_p8 }
  0x1f   :  { %v53_v4 = vpop.eup %52 }
  0x20   :  { %v55_v5 = vpop.eup %54  ;;  %v27_v6 = vmul.f32 0.6125282, %v53_v4 }
  0x21   :  { %v28_v7 = vmul.f32 0.6125282, %v55_v5 }
  0x22   :  { %v29_v8 = vadd.f32 0.9187923, %v27_v6 }
  0x23   :  { %v30_v9 = vadd.f32 0.9187923, %v28_v7 }
  0x24   :  { %v31_v10 = vmul.f32 %v29_v8, %v21_v0 }
  0x25   :  { %v32_v11 = vmul.f32 %v30_v9, %v22_v1 }
  0x26   :  { %33 = vst [vmem:[#allocation5] sm:$0xff] %v31_v10 }
  0x27   :  { %34 = vst [vmem:[#allocation5 + $0x8] sm:$0xff] %v32_v11 }
  0x28   :  { %89 = shalt.err (!%p86_p12)
}
  0x29   :  { %s90_s22 = scalar_lea.hbm %s141_s1, 256 }
  0x2a   :  { %p91_p13 = scmp.ne.s32.totalorder %s141_s1, %s90_s22  ;;  %p94_p0 = scmp.lt.u32.totalorder %s90_s22, %s141_s1 }
  0x2c   :  { %p96_p1 = pnand %p94_p0, %p91_p13 }
  0x2e   :  { %99 = shalt.err (!%p96_p1)
}
  0x2f   :  { %44 = dma.vmem_to_hbm [thread:$0]  %s42_s19, 256, %s141_s1, [#allocation4]  }
  0x30   :  { %102 = dma.done.wait [#allocation4], 256  }
  0x31   :  { %103 = vsyncadd [#allocation4], 4294967040 }
  0x32   :  { %48 = vsyncpa [#allocation3], 1 }
  0x33   :  { %49 = vsyncpa [#allocation4], 1 }

</bundles_post_ra>
